<compile_context>
chip_gen: v7x
topology: tpu7x:2x2x1
jax: 0.10.0
libtpu: 0.0.40
codegen_flags: <defaults>
</compile_context>

<pallas_src>
import jax
import jax.numpy as jnp
from jax.experimental import pallas as pl
from jax.experimental.pallas import tpu as pltpu


def _spectral_block_kernel(x_ref, w_ref, o_ref):
    # x_ref: (Tm, B, 2*Cin)   w_ref: (Tm, 2*Cin, Cop)   o_ref: (Tm, B, Cop)
    # One batched (over the mode tile) real matmul == fused complex matmul.
    o_ref[...] = jax.lax.dot_general(
        x_ref[...], w_ref[...],
        dimension_numbers=(((2,), (1,)), ((0,), (0,))),
        preferred_element_type=jnp.float32,
    ).astype(o_ref.dtype)


def spectral_mode_matmul(x_block, w_block, tile_modes):
    """x_block: (M, B, 2*Cin); w_block: (M, 2*Cin, Cop) -> (M, B, Cop) float32."""
    M, B, Cin2 = x_block.shape
    Cop = w_block.shape[-1]
    assert M % tile_modes == 0
    grid = (M // tile_modes,)

    x_spec = pl.BlockSpec((tile_modes, B, Cin2), lambda m: (m, 0, 0))
    w_spec = pl.BlockSpec((tile_modes, Cin2, Cop), lambda m: (m, 0, 0))
    o_spec = pl.BlockSpec((tile_modes, B, Cop), lambda m: (m, 0, 0))

    return pl.pallas_call(
        _spectral_block_kernel,
        out_shape=jax.ShapeDtypeStruct((M, B, Cop), jnp.float32),
        grid_spec=pltpu.PrefetchScalarGridSpec(
            num_scalar_prefetch=0,
            grid=grid,
            in_specs=[x_spec, w_spec],
            out_specs=o_spec,
        ),
        compiler_params=pltpu.CompilerParams(
            dimension_semantics=("parallel",),
            vmem_limit_bytes=32 * 1024 * 1024,
        ),
    )(x_block, w_block)


def _choose_tile_modes(M, B, Cin2, Cop):
    """Pick a mode-tile size from a conservative VMEM budget (fits v5e/v7x)."""
    per_mode_bytes = 4 * (B * Cin2 + Cin2 * Cop + B * Cop)     # f32, one buffer set
    budget = 8 * 1024 * 1024                                   # leave headroom
    tm = max(1, budget // (2 * per_mode_bytes))                # double-buffered
    tm = min(64, tm, M)
    if M > 1:
        # Keep at least 2 grid steps so v7x's two TensorCores both get work.
        tm = min(tm, -(-M // 2))
    return max(1, tm)


def spectral_conv1d(x, weights, modes, *, tile_modes=None, use_bf16=False):
    """x: (B, C_in, N) float32; weights: (C_in, C_out, modes, 2) float32."""
    B, Cin, N = x.shape
    Cout = weights.shape[1]
    n_freq = N // 2 + 1
    M = modes

    # TODO(synk): rfft/irfft have no Pallas TPU primitive; performed in plain JAX.
    x_ft = jnp.fft.rfft(x)[:, :, :M]                            # (B, Cin, M) complex64
    x_m = jnp.transpose(x_ft, (2, 0, 1))                        # (M, B, Cin)
    x_block = jnp.concatenate(
        [jnp.real(x_m), jnp.imag(x_m)], axis=-1).astype(jnp.float32)  # (M, B, 2*Cin)

    # Fused complex-as-real weight block: [[wr, wi], [-wi, wr]] -> (M, 2*Cin, 2*Cout).
    # (In a real layer this is static per layer and would be precomputed once.)
    wr = jnp.transpose(weights[..., 0], (2, 0, 1))              # (M, Cin, Cout)
    wi = jnp.transpose(weights[..., 1], (2, 0, 1))
    w_block = jnp.concatenate(
        [jnp.concatenate([wr, wi], axis=-1),
         jnp.concatenate([-wi, wr], axis=-1)], axis=1).astype(jnp.float32)

    # Lane-dense output: pad the (re|im) lane axis up to 128 when channels are small.
    co2 = 2 * Cout
    Cop = 128 if co2 < 128 else co2
    if Cop != co2:
        w_block = jnp.pad(w_block, ((0, 0), (0, 0), (0, Cop - co2)))

    Cin2 = 2 * Cin
    tm = tile_modes if tile_modes is not None else _choose_tile_modes(M, B, Cin2, Cop)
    tm = min(tm, M)
    num_tiles = -(-M // tm)
    M_pad = num_tiles * tm
    if M_pad != M:
        x_block = jnp.pad(x_block, ((0, M_pad - M), (0, 0), (0, 0)))
        w_block = jnp.pad(w_block, ((0, M_pad - M), (0, 0), (0, 0)))

    if use_bf16:
        # Optional (v6e MXU is bf16-native); accumulation stays f32 in the kernel.
        x_block = x_block.astype(jnp.bfloat16)
        w_block = w_block.astype(jnp.bfloat16)

    out = spectral_mode_matmul(x_block, w_block, tm)            # (M_pad, B, Cop)
    out = out[:M]
    out_re = out[:, :, :Cout]
    out_im = out[:, :, Cout:co2]

    out_modes = (out_re + 1j * out_im).astype(jnp.complex64)    # (M, B, Cout)
    out_modes = jnp.transpose(out_modes, (1, 2, 0))             # (B, Cout, M)

    # Zero-fill the remaining frequencies via pad (no zeros + scatter round trip).
    out_ft = jnp.pad(out_modes, ((0, 0), (0, 0), (0, n_freq - M)))

    y = jnp.fft.irfft(out_ft, n=N)                              # (B, Cout, N)
    return y.astype(jnp.float32)


def _reference(x, weights, modes):
    """Pure-JAX reference matching the PyTorch module."""
    B, Cin, N = x.shape
    Cout = weights.shape[1]
    n_freq = N // 2 + 1
    w_c = weights[..., 0] + 1j * weights[..., 1]                # (Cin, Cout, modes)
    x_ft = jnp.fft.rfft(x)
    out_ft = jnp.zeros((B, Cout, n_freq), dtype=jnp.complex64)
    out_ft = out_ft.at[:, :, :modes].set(
        jnp.einsum('bix,iox->box', x_ft[:, :, :modes], w_c))
    return jnp.fft.irfft(out_ft, n=N).astype(jnp.float32)


if __name__ == "__main__":
    B, Cin, Cout, N, modes = 2, 4, 4, 16, 8

    key = jax.random.PRNGKey(0)
    kx, kw = jax.random.split(key)
    x = jax.random.normal(kx, (B, Cin, N), dtype=jnp.float32)

    # Deterministic parameter init, mirroring scale * torch.rand(Cin, Cout, modes, 2).
    scale = 1.0 / (Cin * Cout)
    weights = scale * jax.random.uniform(kw, (Cin, Cout, modes, 2), dtype=jnp.float32)

    y = spectral_conv1d(x, weights, modes)
    y = jax.block_until_ready(y)

    y_ref = jax.block_until_ready(_reference(x, weights, modes))
    assert y.shape == (B, Cout, N)
    assert jnp.allclose(y, y_ref, atol=1e-5, rtol=1e-5)

    print("KERNEL_OK")
</pallas_src>

<mosaic_0001>
module attributes {stable_mosaic.version = 11 : i64} {
  func.func @_spectral_block_kernel(%arg0: i32, %arg1: memref<4x2x8xf32, #tpu.memory_space<vmem>>, %arg2: memref<4x8x128xf32, #tpu.memory_space<vmem>>, %arg3: memref<4x2x128xf32, #tpu.memory_space<vmem>>) attributes {dimension_semantics = [#tpu.dimension_semantics<parallel>], iteration_bounds = array<i64: 2>, scalar_prefetch = 0 : i64, scratch_operands = 0 : i64, tpu.core_type = #tpu.core_type<tc>, window_params = [{transform_indices = @transform_0, window_bounds = array<i64: 4, 2, 8>}, {transform_indices = @transform_1, window_bounds = array<i64: 4, 8, 128>}, {transform_indices = @transform_2, window_bounds = array<i64: 4, 2, 128>}]} {
    %c0 = arith.constant 0 : index
    %c0_0 = arith.constant 0 : index
    %c0_1 = arith.constant 0 : index
    %0 = vector.load %arg1[%c0, %c0_0, %c0_1] : memref<4x2x8xf32, #tpu.memory_space<vmem>>, vector<4x2x8xf32>
    %c0_2 = arith.constant 0 : index
    %c0_3 = arith.constant 0 : index
    %c0_4 = arith.constant 0 : index
    %1 = vector.load %arg2[%c0_2, %c0_3, %c0_4] : memref<4x8x128xf32, #tpu.memory_space<vmem>>, vector<4x8x128xf32>
    %cst = arith.constant dense<0.000000e+00> : vector<4x2x128xf32>
    %2 = tpu.matmul %0, %1, %cst {dimension_numbers = #tpu.dot_dimension_numbers<[2], [1], [1], [2], [0, 0, 0, 1, 1, 2], [0], [0]>} : vector<4x2x8xf32>, vector<4x8x128xf32>, vector<4x2x128xf32> -> vector<4x2x128xf32>
    %c0_5 = arith.constant 0 : index
    %c0_6 = arith.constant 0 : index
    %c0_7 = arith.constant 0 : index
    %3 = vector.load %arg3[%c0_5, %c0_6, %c0_7] : memref<4x2x128xf32, #tpu.memory_space<vmem>>, vector<4x2x128xf32>
    tpu.vector_store %arg3[%c0_5, %c0_6, %c0_7], %2 {strides = array<i32>} : memref<4x2x128xf32, #tpu.memory_space<vmem>>, vector<4x2x128xf32>,
    return
  }
  func.func @transform_0(%arg0: i32) -> (i32, i32, i32) {
    %c0_i32 = arith.constant 0 : i32
    %c0_i32_0 = arith.constant 0 : i32
    %c0_i32_1 = arith.constant 0 : i32
    return %arg0, %c0_i32, %c0_i32_0 : i32, i32, i32
  }
  func.func @transform_1(%arg0: i32) -> (i32, i32, i32) {
    %c0_i32 = arith.constant 0 : i32
    %c0_i32_0 = arith.constant 0 : i32
    %c0_i32_1 = arith.constant 0 : i32
    return %arg0, %c0_i32, %c0_i32_0 : i32, i32, i32
  }
  func.func @transform_2(%arg0: i32) -> (i32, i32, i32) {
    %c0_i32 = arith.constant 0 : i32
    %c0_i32_0 = arith.constant 0 : i32
    %c0_i32_1 = arith.constant 0 : i32
    return %arg0, %c0_i32, %c0_i32_0 : i32, i32, i32
  }
}

</mosaic_0001>

<bundles_post_ra>
// kernel: tpu_custom_call.1
= control target key start
LH: loop header
LB: loop body
LE: loop exit
PB: predicated region body
PF: predicated region fallthrough
CT: control target
= control target key end

     0   :  { %7 = vsyncpa [#allocation3], 0  ;;  %s1114_s0 = inlined_call_operand.hbm [shape: f32[8,2,8], index: 0, kind: input, shape index: {}]   ;;  %s1115_s1 = inlined_call_operand.hbm [shape: f32[8,8,128], index: 1, kind: input, shape index: {}]   ;;  %s1116_s2 = inlined_call_operand.hbm [shape: f32[8,2,128], index: 2, kind: output, shape index: {}]  }
   0x1   :  { %9 = vsyncpa [#allocation3 + $0x1], 0 }
   0x2   :  { %10 = vsyncpa [#allocation6], 0 }
   0x3   :  { %12 = vsyncpa [#allocation6 + $0x1], 0 }
   0x4   :  { %13 = vsyncpa [#allocation4], 0 }
   0x5   :  { %15 = vsyncpa [#allocation4 + $0x1], 0  ;;  %s890_s9 = smov 0   ;;  %s892_s10 = smov 0  }
   0x6   :  { %s894_s11 = smov 0   ;;  %s896_s12 = smov 0  }
   0x7 LB: > { %s911_s13 = sadd.s32 4294967295, %s862_s12   ;;  %s620_s14 = sadd.s32 4294967294, %s862_s12   ;;  %s862_s12 = sphi %s896_s12, %s1132_s12   ;;  %s858_s11 = sphi %s894_s11, %s1131_s11   ;;  %s854_s10 = sphi %s892_s10, %s1130_s10   ;;  %s850_s9 = sphi %s890_s9, %s1129_s9  }
   0x8   : > { %s915_s15 = sadd.s32 1, %s862_s12   ;;  %s28_s16 = sadd.s32 1, %s858_s11 }
   0x9   : > { %s25_s17 = ssub.s32 %s862_s12, %s915_s15  ;;  %p35_p0 = scmp.ne.s32.totalorder %s858_s11, %s854_s10 }
   0xa   : > { %p26_p1 = scmp.eq.s32.totalorder %s25_s17, 0  ;;  %p36_p2 = scmp.eq.s32.totalorder %s862_s12, 0 }
   0xb   : > { %p41_p3 = scmp.ne.s32.totalorder %s854_s10, %s850_s9  ;;  %p42_p4 = scmp.eq.s32.totalorder %s911_s13, 0 }
   0xc   : > { %s927_s18 = scalar_select %p26_p1, %s858_s11, %s28_s16  }
   0xd   : > { %p929_p5 = por %p36_p2, %p35_p0  ;;  %p933_p6 = por %p42_p4, %p41_p3 }
   0xe   : > { %p91_p7 = scmp.eq.s32.totalorder %s911_s13, 1  ;;  %p97_p8 = scmp.eq.s32.totalorder %s620_s14, 1 }
   0xf   : > { %s1120_s20 = scalar_select %p933_p6, 1, 0 }
  0x10   : > { %p690_p10 = scmp.lt.s32.totalorder %s862_s12, 2  ;;  %p940_p11 = por %p91_p7, %p35_p0 }
  0x11   : > { %p944_p12 = por %p97_p8, %p41_p3  ;;  %s949_s23 = sand.u32 1, %s858_s11  }
  0x12   : > { %s1121_s21 = scalar_select %p940_p11, 1, 0 }
  0x13   : > { %s1122_s22 = scalar_select %p944_p12, 1, 0 }
  0x14   : > { %s642_s24 = sshll.u32 %s862_s12, 7  ;;  %s623_s25 = sshll.u32 %s949_s23, 3 }
  0x15   : > { %s956_s28 = scalar_lea.hbm %s1114_s0, %s642_s24  ;;  %s121_s29 = scalar_lea.vmem [#allocation2], %s623_s25 }
  0x16   : > { %s128_s30 = sshll.u32 %s121_s29, 4  ;;  %p960_p13 = pnand %p690_p10, %p929_p5  ;;  %s964_s30 = int_to_ptr.vmem [resolvable:$true] %s128_s30 }
  0x17   : > { %s118_s4 = scalar_lea.sflag [#allocation3], %s949_s23  ;;  %s732_s5 = scalar_lea.hbm %s956_s28, 128 }
  0x18   : > { %p733_p0 = scmp.ne.s32.totalorder %s956_s28, %s732_s5  ;;  %p734_p1 = pneg %p960_p13 }
  0x19   : > { %s737_s8 = scalar_lea.hbm %s1114_s0, 256  ;;  %p738_p4 = scmp.lt.u32.totalorder %s956_s28, %s1114_s0 }
  0x1a   : > { %p735_p2 = pnand %p734_p1, %p733_p0  ;;  %p739_p5 = scmp.lt.u32.totalorder %s737_s8, %s732_s5 }
  0x1b   : > { %p741_p8 = scmp.lt.u32.totalorder %s732_s5, %s956_s28 }
  0x1c   : > { %p736_p3 = pneg %p735_p2  ;;  %p740_p7 = por %p739_p5, %p738_p4 }
  0x1e   : > { %p742_p10 = por %p741_p8, %p740_p7 }
  0x20   : > { %p743_p9 = pnand %p742_p10, %p736_p3 }
  0x22   : > { %746 = shalt.err (!%p743_p9)
}
  0x23   : > { %s747_s17 = scalar_lea.vmem %s964_s30, 128  ;;  %s864_s19 = smov [#allocation2]  }
  0x24   : > { %p748_p0 = scmp.ne.s32.totalorder %s964_s30, %s747_s17  ;;  %s752_s24 = sshll.u32 %s864_s19, 4  ;;  %s753_s24 = int_to_ptr.vmem [resolvable:$false] %s752_s24 }
  0x25   : > { %s754_s25 = scalar_lea.vmem %s753_s24, 256  ;;  %p755_p11 = scmp.lt.s32.totalorder %s964_s30, %s753_s24 }
  0x26   : > { %p750_p2 = pnand %p748_p0, %p734_p1  ;;  %p756_p4 = scmp.lt.s32.totalorder %s754_s25, %s747_s17 }
  0x28   : > { %p751_p12 = pneg %p750_p2  ;;  %p757_p5 = por %p756_p4, %p755_p11 }
  0x2a   : > { %p758_p7 = pnand %p757_p5, %p751_p12 }
  0x2c   : > { %761 = shalt.err (!%p758_p7)
}
  0x2d   : > { %s865_s26 = smov 32   ;;  %s866_s27 = smov 2  }
  0x2e   : > { %682 = dma.hbm_to_vmem [thread:$0]  (!%p960_p13), %s956_s28, 128, %s964_s30, %s118_s4, %s865_s26, %s865_s26, %s866_s27  }
  0x2f   : > { %p629_p9 = scmp.ge.s32.totalorder %s862_s12, 1  ;;  %p157_p3 = scmp.lt.s32.totalorder %s862_s12, 3 }
  0x30   : > { %s626_s29 = sshll.u32 %s949_s23, 5  ;;  %s643_s6 = sshll.u32 %s862_s12, 9 }
  0x31   : > { %p997_p11 = pnand %p629_p9, %p157_p3  ;;  %s142_s7 = scalar_lea.vmem [#allocation5], %s626_s29 }
  0x32   : > { %s149_s8 = sshll.u32 %s142_s7, 4  ;;  %s1005_s17 = scalar_lea.hbm %s1115_s1, %s643_s6  ;;  %s1007_s8 = int_to_ptr.vmem [resolvable:$true] %s149_s8 }
  0x33   : > { %s139_s28 = scalar_lea.sflag [#allocation6], %s949_s23  ;;  %s762_s30 = scalar_lea.hbm %s1005_s17, 512 }
  0x34   : > { %p763_p12 = scmp.ne.s32.totalorder %s1005_s17, %s762_s30  ;;  %s767_s24 = scalar_lea.hbm %s1115_s1, 1024 }
  0x35   : > { %p768_p0 = scmp.lt.u32.totalorder %s1005_s17, %s1115_s1  ;;  %p769_p2 = scmp.lt.u32.totalorder %s767_s24, %s762_s30 }
  0x36   : > { %p765_p8 = pnand %p763_p12, %p734_p1  ;;  %p771_p5 = scmp.lt.u32.totalorder %s762_s30, %s1005_s17 }
  0x37   : > { %p770_p4 = por %p769_p2, %p768_p0 }
  0x38   : > { %p766_p10 = pneg %p765_p8 }
  0x39   : > { %p772_p7 = por %p771_p5, %p770_p4 }
  0x3b   : > { %p773_p9 = pnand %p772_p7, %p766_p10 }
  0x3d   : > { %776 = shalt.err (!%p773_p9)
}
  0x3e   : > { %s777_s27 = scalar_lea.vmem %s1007_s8, 512  ;;  %s867_s29 = smov [#allocation5]  }
  0x3f   : > { %p778_p3 = scmp.ne.s32.totalorder %s1007_s8, %s777_s27  ;;  %s782_s6 = sshll.u32 %s867_s29, 4  ;;  %s783_s6 = int_to_ptr.vmem [resolvable:$false] %s782_s6 }
  0x40   : > { %s784_s7 = scalar_lea.vmem %s783_s6, 1024  ;;  %p785_p6 = scmp.lt.s32.totalorder %s1007_s8, %s783_s6 }
  0x41   : > { %p780_p12 = pnand %p778_p3, %p734_p1  ;;  %p786_p0 = scmp.lt.s32.totalorder %s784_s7, %s777_s27 }
  0x43   : > { %p781_p8 = pneg %p780_p12  ;;  %p787_p2 = por %p786_p0, %p785_p6 }
  0x45   : > { %p788_p4 = pnand %p787_p2, %p781_p8 }
  0x47   : > { %791 = shalt.err (!%p788_p4)
}
  0x48   : > { %s868_s14 = smov 128   ;;  %s869_s16 = smov 8  }
  0x49   : > { %685 = dma.hbm_to_vmem [thread:$0]  (!%p960_p13), %s1005_s17, 512, %s1007_s8, %s139_s28, %s868_s14, %s868_s14, %s869_s16  }
  0x4a   : > { %161 = sbr.rel (%p997_p11) target bundleno = 320 (0x140), region = 28  ;;  %s1038_s30 = sand.u32 (!%p997_p11), 1, %s854_s10  }
  0x4b   : > { %s630_s4 = sshll.u32 (!%p997_p11), %s1038_s30, 3  ;;  %s164_s19 = scalar_lea.sflag (!%p997_p11), [#allocation3], %s1038_s30 }
  0x4c   : > { %s167_s24 = scalar_lea.vmem (!%p997_p11), [#allocation2], %s630_s4  ;;  %p1125_p6 = scmp.ne.s32.totalorder (!%p997_p11), %s1120_s20, 0 }
  0x51   : > { %837 = dma.done.wait (%p1125_p6), %s164_s19, 128  }
  0x52   : > { %839 = vsyncadd (%p1125_p6), %s164_s19, 4294967168  ;;  %s631_s23 = sshll.u32 %s1038_s30, 5  ;;  %s173_s3 = scalar_lea.sflag [#allocation6], %s1038_s30 }
  0x53   : > { %s176_s5 = scalar_lea.vmem [#allocation5], %s631_s23 }
  0x54   : > { %841 = dma.done.wait (%p1125_p6), %s173_s3, 512  }
  0x55   : > { %843 = vsyncadd (%p1125_p6), %s173_s3, 4294966784  ;;  %v870_v0 = vmov 0.0   ;;  %vm871_vm0 = vmmov 0   ;;  %vm213_vm1 = vcmask 64512   ;;  %v209_v1 = vld [vmem:[%s176_s5] sm:$0xff]  ;;  %v210_v2 = vld [vmem:[%s176_s5 + $0x8] sm:$0xff] }
  0x56   : > { %653 = vmatprep.subr.mxu0 %v870_v0  ;;  %658 = vmatprep.subr.mxu1 %v870_v0  ;;  %v205_v3 = vld [vmem:[%s167_s24] sm:$0x3]  ;;  %v206_v4 = vld [vmem:[%s167_s24 + $0x2] sm:$0x3]  ;;  %v207_v7 = vld [vmem:[%s167_s24 + $0x4] sm:$0x3] }
  0x57   : > { %655 = vmatprep.mubr.msk.f32.mxu0 %vm871_vm0, %v870_v0  ;;  %660 = vmatprep.mubr.msk.f32.mxu1 %vm871_vm0, %v870_v0  ;;  %v211_v5 = vld [vmem:[%s176_s5 + $0x10] sm:$0xff]  ;;  %v212_v6 = vld [vmem:[%s176_s5 + $0x18] sm:$0xff]  ;;  %s201_s20 = scalar_lea.vmem [#allocation7], %s630_s4  ;;  %s644_s17 = sshll.u32 %s911_s13, 7 }
  0x58   : > { %654 = vmatpush3.msra.mxu0 %v209_v1  ;;  %659 = vmatpush3.msra.mxu1 %v210_v2  ;;  %v208_v8 = vld [vmem:[%s167_s24 + $0x6] sm:$0x3]  ;;  %s524_s8 = sshll.u32 %s201_s20, 4  ;;  %s1070_s26 = scalar_lea.hbm %s1116_s2, %s644_s17  ;;  %s1065_s8 = int_to_ptr.vmem [resolvable:$true] %s524_s8 }
  0x59   : > { %656 = vmatmul.mubr.msk.f32.vlgmr.msra.gmra.mrb[0].mxu0 %vm213_vm1, %v205_v3  ;;  %661 = vmatmul.mubr.msk.f32.vlgmr.msra.gmra.mrb[0].mxu1 %vm213_vm1, %v206_v4  ;;  %s511_s13 = scalar_lea.sflag [#allocation4], %s1038_s30  ;;  %s792_s27 = scalar_lea.vmem %s1065_s8, 128 }
  0x5a   : > { %663 = vmatprep.subr.mxu0 %v870_v0  ;;  %668 = vmatprep.subr.mxu1 %v870_v0  ;;  %p793_p13 = scmp.ne.s32.totalorder %s1065_s8, %s792_s27  ;;  %p1126_p1 = scmp.ne.s32.totalorder %s1121_s21, 0 }
  0x5b   : > { %664 = vmatpush3.msra.mxu0 %v211_v5  ;;  %669 = vmatpush3.msra.mxu1 %v212_v6  ;;  %s872_s29 = smov [#allocation7]  }
  0x5c   : > { %665 = vmatprep.mubr.msk.f32.mxu0 %vm871_vm0, %v870_v0  ;;  %670 = vmatprep.mubr.msk.f32.mxu1 %vm871_vm0, %v870_v0  ;;  %p794_p11 = pnand %p793_p13, %p1126_p1  ;;  %s796_s6 = sshll.u32 %s872_s29, 4  ;;  %s797_s6 = int_to_ptr.vmem [resolvable:$false] %s796_s6 }
  0x5d   : > { %666 = vmatmul.mubr.msk.f32.vlgmr.msra.gmra.mrb[2].mxu0 %vm213_vm1, %v207_v7  ;;  %671 = vmatmul.mubr.msk.f32.vlgmr.msra.gmra.mrb[2].mxu1 %vm213_vm1, %v208_v8  ;;  %s798_s7 = scalar_lea.vmem %s797_s6, 256  ;;  %p799_p5 = scmp.lt.s32.totalorder %s1065_s8, %s797_s6 }
  0x5e   : > { %p795_p10 = pneg %p794_p11  ;;  %p800_p7 = scmp.lt.s32.totalorder %s798_s7, %s792_s27 }
  0x60   : > { %p801_p9 = por %p800_p7, %p799_p5 }
  0x62   : > { %p802_p3 = pnand %p801_p9, %p795_p10 }
 0x12c   : > { %v283_v9 = vpop.f32.mrb[0].mxu0  ;;  %v356_v10 = vpop.f32.mrb[0].mxu1 }
 0x12d   : > { %506 = vst [vmem:[%s201_s20] sm:$0x3] %v283_v9  ;;  %507 = vst [vmem:[%s201_s20 + $0x2] sm:$0x3] %v356_v10  ;;  %v657_v11 = vpop.f32.mrb[1].mxu0  ;;  %v662_v12 = vpop.f32.mrb[1].mxu1 }
 0x130   : > { %v429_v13 = vpop.f32.mrb[2].mxu0  ;;  %v502_v14 = vpop.f32.mrb[2].mxu1 }
 0x131   : > { %508 = vst [vmem:[%s201_s20 + $0x4] sm:$0x3] %v429_v13  ;;  %509 = vst [vmem:[%s201_s20 + $0x6] sm:$0x3] %v502_v14  ;;  %v667_v15 = vpop.f32.mrb[3].mxu0  ;;  %v672_v16 = vpop.f32.mrb[3].mxu1 }
 0x132   : > { %805 = shalt.err (!%p802_p3)
}
 0x133   : > { %s806_s14 = scalar_lea.hbm %s1070_s26, 128  ;;  %s810_s19 = scalar_lea.hbm %s1116_s2, 256 }
 0x134   : > { %p807_p12 = scmp.ne.s32.totalorder %s1070_s26, %s806_s14  ;;  %p811_p2 = scmp.lt.u32.totalorder %s1070_s26, %s1116_s2 }
 0x135   : > { %p812_p4 = scmp.lt.u32.totalorder %s810_s19, %s806_s14  ;;  %p814_p13 = scmp.lt.u32.totalorder %s806_s14, %s1070_s26 }
 0x136   : > { %p808_p8 = pnand %p807_p12, %p1126_p1 }
 0x137   : > { %p813_p6 = por %p812_p4, %p811_p2 }
 0x138   : > { %p809_p0 = pneg %p808_p8 }
 0x139   : > { %p815_p11 = por %p814_p13, %p813_p6 }
 0x13b   : > { %p816_p10 = pnand %p815_p11, %p809_p0 }
 0x13d   : > { %819 = shalt.err (!%p816_p10)
}
 0x13e   : > { %s873_s3 = smov 32   ;;  %s874_s5 = smov 2  }
 0x13f   : > { %677 = dma.vmem_to_hbm [thread:$0]  (%p1126_p1), %s1065_s8, 128, %s1070_s26, %s511_s13, %s873_s3, %s873_s3, %s874_s5  }
 0x140 PF: > { %s539_s20 = sand.u32 1, %s850_s9   ;;  %p1127_p5 = scmp.ne.s32.totalorder %s1122_s22, 0 }
 0x141   : > { %p1128_p7 = scmp.ge.s32.totalorder %s862_s12, 2  ;;  %s540_s17 = scalar_lea.sflag [#allocation4], %s539_s20 }
 0x143   : > { %p687_p9 = pnand %p1128_p7, %p1127_p5 }
 0x145   : > { %845 = dma.done.wait (!%p687_p9), %s540_s17, 128  }
 0x146   : > { %847 = vsyncadd (!%p687_p9), %s540_s17, 4294967168  ;;  %p18_p3 = scmp.ge.s32.totalorder %s915_s15, 4   ;;  %s1129_s9 = smov %s854_s10 }
 0x147   : > { %s1130_s10 = smov %s858_s11  ;;  %s1131_s11 = smov %s927_s18 }
 0x148   : > { %s1132_s12 = smov %s915_s15  ;;  %20 = sbr.rel (!%p18_p3) target bundleno = 7 (0x7), region = 86 }
 0x14f   :  { %545 = vsyncpa [#allocation3], 1 }
 0x150   :  { %547 = vsyncpa [#allocation3 + $0x1], 1 }
 0x151   :  { %548 = vsyncpa [#allocation6], 1 }
 0x152   :  { %550 = vsyncpa [#allocation6 + $0x1], 1 }
 0x153   :  { %551 = vsyncpa [#allocation4], 1 }
 0x154   :  { %553 = vsyncpa [#allocation4 + $0x1], 1 }

</bundles_post_ra>
